<compile_context>
chip_gen: v6e
topology: v6e:2x2x1
jax: 0.10.0
libtpu: 0.0.40
codegen_flags: <defaults>
</compile_context>

<pallas_src>
import jax
import jax.numpy as jnp
from jax import lax
from jax.experimental import pallas as pl
from jax.experimental.pallas import tpu as pltpu


def _vmem_capacity_bytes():
    try:
        return int(pltpu.get_tpu_info().vmem_capacity_bytes)
    except Exception:
        return 64 * 1024 * 1024  # v7x per-TC VMEM (smallest current generation)


def _vmem_bytes(tm, tn, in_f, rank, x_item, w_item, o_item):
    """Rough (slightly conservative) VMEM footprint of the pipeline buffers."""
    rank_l = max(rank, 128)                     # lane padding of narrow minor dims
    return (2 * tm * in_f * x_item              # x row tile, double-buffered
            + 2 * rank * in_f * w_item          # V (constant-index block)
            + 2 * tn * rank_l * w_item          # U column tile
            + 2 * 8 * tn * w_item               # bias tile (sublane-padded)
            + 2 * tm * tn * o_item              # output tile
            + tm * rank_l * 4)                  # t scratch (f32)


def _pick_tiles(M, in_f, out_f, rank, x_item, w_item, o_item, budget):
    # Row tile: prefer the whole M when small (single block, no constraint),
    # otherwise a large multiple of 8 that keeps the double-buffered x tile in budget.
    tm_cands = [t for t in (512, 256, 128, 64, 32, 16, 8) if t <= M]
    if M <= 512:
        tm_cands = [M] + tm_cands
    if not tm_cands:
        tm_cands = [M]
    # Out tile: prefer the full out_features (out axis disappears -> no reuse
    # issue at all), otherwise the largest multiple of 128 that fits.
    if out_f <= 2048:
        tn_cands = [out_f]
    else:
        tn_cands = [2048, 1024, 512, 256, 128]
    for tm in tm_cands:
        for tn in tn_cands:
            need = _vmem_bytes(tm, tn, in_f, rank, x_item, w_item, o_item)
            if need <= budget:
                return tm, tn, need
    tm, tn = tm_cands[-1], tn_cands[-1]
    return tm, tn, _vmem_bytes(tm, tn, in_f, rank, x_item, w_item, o_item)


def _shared_masked_fc2_kernel(x_ref, v_ref, u_ref, b_ref, o_ref, t_ref):
    # Stage 1: t = x @ V^T (contract in_features).  Computed once per row tile
    # and carried across the out axis in VMEM scratch (out axis is "arbitrary").
    @pl.when(pl.program_id(1) == 0)
    def _():
        t_ref[...] = lax.dot_general(
            x_ref[...], v_ref[...],
            dimension_numbers=(((1,), (1,)), ((), ())),
            preferred_element_type=jnp.float32,
        )                                                   # (tm, rank) f32
    # Stage 2: y = t @ U^T (contract rank).  Cast t to the weight dtype so the
    # fast bf16 MXU path is used for bf16 inputs (no-op for f32 inputs).
    y = lax.dot_general(
        t_ref[...].astype(u_ref.dtype), u_ref[...],
        dimension_numbers=(((1,), (1,)), ((), ())),
        preferred_element_type=jnp.float32,
    )                                                       # (tm, tn) f32
    o_ref[...] = (y + b_ref[...].astype(jnp.float32)).astype(o_ref.dtype)


def shared_masked_fc2(x, U, V, bias=None, *, tm=None, tn=None):
    """y = x @ (U @ V)^T + bias, matching torch.nn.functional.linear."""
    out_features, rank = U.shape
    rank_v, in_features = V.shape
    assert rank == rank_v
    assert x.shape[-1] == in_features
    if bias is None:
        bias = jnp.zeros((out_features,), dtype=U.dtype)
    assert bias.shape == (out_features,)

    lead_shape = x.shape[:-1]
    x2d = x.reshape(-1, in_features)
    M = x2d.shape[0]
    bias2d = bias.reshape(1, out_features)

    x_item = x.dtype.itemsize
    w_item = U.dtype.itemsize
    vmem_cap = _vmem_capacity_bytes()
    tm_auto, tn_auto, _ = _pick_tiles(M, in_features, out_features, rank,
                                      x_item, w_item, x_item, vmem_cap // 2)
    tm_eff = tm if tm is not None else tm_auto
    tn_eff = tn if tn is not None else tn_auto
    need = _vmem_bytes(tm_eff, tn_eff, in_features, rank, x_item, w_item, x_item)
    vmem_limit = int(min(vmem_cap * 3 // 4, max(need + (4 << 20), 32 << 20)))

    # Out axis innermost so the x tile / t scratch are reused across out tiles.
    grid = (pl.cdiv(M, tm_eff), pl.cdiv(out_features, tn_eff))

    flops = 2 * M * rank * (in_features + out_features)
    bytes_accessed = (x2d.size * x_item + U.size * w_item + V.size * w_item
                      + bias.size * w_item + M * out_features * x_item)

    out = pl.pallas_call(
        _shared_masked_fc2_kernel,
        out_shape=jax.ShapeDtypeStruct((M, out_features), x.dtype),
        grid_spec=pltpu.PrefetchScalarGridSpec(
            num_scalar_prefetch=0,
            grid=grid,
            in_specs=[
                pl.BlockSpec((tm_eff, in_features), lambda i, j: (i, 0)),  # x rows
                pl.BlockSpec((rank, in_features), lambda i, j: (0, 0)),    # V (full)
                pl.BlockSpec((tn_eff, rank), lambda i, j: (j, 0)),         # U cols
                pl.BlockSpec((1, tn_eff), lambda i, j: (0, j)),            # bias
            ],
            out_specs=pl.BlockSpec((tm_eff, tn_eff), lambda i, j: (i, j)),
            # Stage-1 result carried across the out axis.
            scratch_shapes=[pltpu.VMEM((tm_eff, rank), jnp.float32)],
        ),
        compiler_params=pltpu.CompilerParams(
            # Row tiles parallel (v7x megacore); out axis arbitrary because the
            # t scratch is carried across it.
            dimension_semantics=("parallel", "arbitrary"),
            vmem_limit_bytes=vmem_limit,
        ),
        cost_estimate=pl.CostEstimate(
            flops=int(flops), transcendentals=0, bytes_accessed=int(bytes_accessed)),
    )(x2d, V, U, bias2d)

    return out.reshape(*lead_shape, out_features)


def shared_masked_fc2_ref(x, U, V, bias):
    w = U.astype(jnp.float32) @ V.astype(jnp.float32)
    return (x.astype(jnp.float32) @ w.T + bias.astype(jnp.float32)).astype(x.dtype)


if __name__ == "__main__":
    key = jax.random.PRNGKey(0)
    k_x, k_u, k_v, k_b = jax.random.split(key, 4)

    batch, seq = 2, 8
    in_features, out_features, rank = 32, 64, 16

    x = jax.random.normal(k_x, (batch, seq, in_features), dtype=jnp.float32)
    U = jax.random.normal(k_u, (out_features, rank), dtype=jnp.float32) * 0.1
    V = jax.random.normal(k_v, (rank, in_features), dtype=jnp.float32) * 0.1
    bias = jax.random.normal(k_b, (out_features,), dtype=jnp.float32) * 0.01

    y = shared_masked_fc2(x, U, V, bias)
    jax.block_until_ready(y)
    y_ref = shared_masked_fc2_ref(x, U, V, bias)
    assert y.shape == (batch, seq, out_features)
    assert jnp.allclose(y, y_ref, atol=1e-4, rtol=1e-4)

    # Second small config: forces a multi-tile out axis (scratch reuse across j)
    # and partial row/out blocks (Pallas masking), still with zero wrapper pads.
    k_x2, k_u2, k_v2, k_b2 = jax.random.split(jax.random.PRNGKey(0), 4)
    in2, out2, rk2 = 40, 192, 8
    x2 = jax.random.normal(k_x2, (1, 20, in2), dtype=jnp.float32)
    U2 = jax.random.normal(k_u2, (out2, rk2), dtype=jnp.float32) * 0.1
    V2 = jax.random.normal(k_v2, (rk2, in2), dtype=jnp.float32) * 0.1
    b2 = jax.random.normal(k_b2, (out2,), dtype=jnp.float32) * 0.01
    y2 = shared_masked_fc2(x2, U2, V2, b2, tm=8, tn=128)
    jax.block_until_ready(y2)
    y2_ref = shared_masked_fc2_ref(x2, U2, V2, b2)
    assert y2.shape == (1, 20, out2)
    assert jnp.allclose(y2, y2_ref, atol=1e-4, rtol=1e-4)

    print("KERNEL_OK")
</pallas_src>

<mosaic_0001>
module attributes {stable_mosaic.version = 11 : i64} {
  func.func @_shared_masked_fc2_kernel(%arg0: i32, %arg1: i32, %arg2: memref<16x32xf32, #tpu.memory_space<vmem>>, %arg3: memref<16x32xf32, #tpu.memory_space<vmem>>, %arg4: memref<64x16xf32, #tpu.memory_space<vmem>>, %arg5: memref<1x64xf32, #tpu.memory_space<vmem>>, %arg6: memref<16x64xf32, #tpu.memory_space<vmem>>, %arg7: memref<16x16xf32, #tpu.memory_space<vmem>>) attributes {dimension_semantics = [#tpu.dimension_semantics<parallel>, #tpu.dimension_semantics<arbitrary>], iteration_bounds = array<i64: 1, 1>, scalar_prefetch = 0 : i64, scratch_operands = 1 : i64, tpu.core_type = #tpu.core_type<tc>, window_params = [{transform_indices = @transform_0, window_bounds = array<i64: 16, 32>}, {pipeline_mode = #tpu.pipeline_mode<synchronous>, transform_indices = @transform_1, window_bounds = array<i64: 16, 32>}, {transform_indices = @transform_2, window_bounds = array<i64: 64, 16>}, {transform_indices = @transform_3, window_bounds = array<i64: 1, 64>}, {transform_indices = @transform_4, window_bounds = array<i64: 16, 64>}]} {
    %c0_i32 = arith.constant 0 : i32
    %0 = arith.cmpi eq, %arg1, %c0_i32 : i32
    %1 = arith.extui %0 : i1 to i32
    %c0_i32_0 = arith.constant 0 : i32
    %2 = arith.cmpi ne, %1, %c0_i32_0 : i32
    scf.if %2 {
      %c0_8 = arith.constant 0 : index
      %c0_9 = arith.constant 0 : index
      %10 = vector.load %arg2[%c0_8, %c0_9] : memref<16x32xf32, #tpu.memory_space<vmem>>, vector<16x32xf32>
      %c0_10 = arith.constant 0 : index
      %c0_11 = arith.constant 0 : index
      %11 = vector.load %arg3[%c0_10, %c0_11] : memref<16x32xf32, #tpu.memory_space<vmem>>, vector<16x32xf32>
      %cst_12 = arith.constant dense<0.000000e+00> : vector<16x16xf32>
      %12 = tpu.matmul %10, %11, %cst_12 {dimension_numbers = #tpu.dot_dimension_numbers<[1], [1], [0], [0], [0, 0, 1, 0], [], []>} : vector<16x32xf32>, vector<16x32xf32>, vector<16x16xf32> -> vector<16x16xf32>
      %c0_13 = arith.constant 0 : index
      %c0_14 = arith.constant 0 : index
      %13 = vector.load %arg7[%c0_13, %c0_14] : memref<16x16xf32, #tpu.memory_space<vmem>>, vector<16x16xf32>
      tpu.vector_store %arg7[%c0_13, %c0_14], %12 {strides = array<i32>} : memref<16x16xf32, #tpu.memory_space<vmem>>, vector<16x16xf32>,
    } else {
    }
    %c0 = arith.constant 0 : index
    %c0_1 = arith.constant 0 : index
    %3 = vector.load %arg7[%c0, %c0_1] : memref<16x16xf32, #tpu.memory_space<vmem>>, vector<16x16xf32>
    %c0_2 = arith.constant 0 : index
    %c0_3 = arith.constant 0 : index
    %4 = vector.load %arg4[%c0_2, %c0_3] : memref<64x16xf32, #tpu.memory_space<vmem>>, vector<64x16xf32>
    %cst = arith.constant dense<0.000000e+00> : vector<16x64xf32>
    %5 = tpu.matmul %3, %4, %cst {dimension_numbers = #tpu.dot_dimension_numbers<[1], [1], [0], [0], [0, 0, 1, 0], [], []>} : vector<16x16xf32>, vector<64x16xf32>, vector<16x64xf32> -> vector<16x64xf32>
    %c0_4 = arith.constant 0 : index
    %c0_5 = arith.constant 0 : index
    %6 = vector.load %arg5[%c0_4, %c0_5] : memref<1x64xf32, #tpu.memory_space<vmem>>, vector<1x64xf32>
    %7 = vector.broadcast %6 : vector<1x64xf32> to vector<16x64xf32>
    %8 = arith.addf %5, %7 : vector<16x64xf32>
    %c0_6 = arith.constant 0 : index
    %c0_7 = arith.constant 0 : index
    %9 = vector.load %arg6[%c0_6, %c0_7] : memref<16x64xf32, #tpu.memory_space<vmem>>, vector<16x64xf32>
    tpu.vector_store %arg6[%c0_6, %c0_7], %8 {strides = array<i32>} : memref<16x64xf32, #tpu.memory_space<vmem>>, vector<16x64xf32>,
    return
  }
  func.func @transform_0(%arg0: i32, %arg1: i32) -> (i32, i32) {
    %c0_i32 = arith.constant 0 : i32
    %c0_i32_0 = arith.constant 0 : i32
    return %arg0, %c0_i32 : i32, i32
  }
  func.func @transform_1(%arg0: i32, %arg1: i32) -> (i32, i32) {
    %c0_i32 = arith.constant 0 : i32
    %c0_i32_0 = arith.constant 0 : i32
    %c0_i32_1 = arith.constant 0 : i32
    return %c0_i32, %c0_i32_0 : i32, i32
  }
  func.func @transform_2(%arg0: i32, %arg1: i32) -> (i32, i32) {
    %c0_i32 = arith.constant 0 : i32
    %c0_i32_0 = arith.constant 0 : i32
    return %arg1, %c0_i32 : i32, i32
  }
  func.func @transform_3(%arg0: i32, %arg1: i32) -> (i32, i32) {
    %c0_i32 = arith.constant 0 : i32
    %c0_i32_0 = arith.constant 0 : i32
    return %c0_i32, %arg1 : i32, i32
  }
  func.func @transform_4(%arg0: i32, %arg1: i32) -> (i32, i32) {
    %c0_i32 = arith.constant 0 : i32
    return %arg0, %arg1 : i32, i32
  }
}

</mosaic_0001>

<bundles_post_ra>
// kernel: tpu_custom_call.1
= control target key start
LH: loop header
LB: loop body
LE: loop exit
PB: predicated region body
PF: predicated region fallthrough
CT: control target
= control target key end

     0   :  { %vm26_vm0 = vcmask 261120   ;;  %vm114_vm1 = vcmask 130048   ;;  %s435_s0 = inlined_call_operand.vmem [shape: f32[16,32], index: 0, kind: input, shape index: {}]   ;;  %s436_s1 = inlined_call_operand.vmem [shape: f32[16,32], index: 1, kind: input, shape index: {}]   ;;  %s437_s2 = inlined_call_operand.vmem [shape: f32[64,16], index: 2, kind: input, shape index: {}]   ;;  %s438_s3 = inlined_call_operand.vmem [shape: f32[1,64], index: 3, kind: input, shape index: {}]   ;;  %s439_s4 = inlined_call_operand.hbm [shape: f32[16,64], index: 4, kind: output, shape index: {}]  }
   0x1   :  { %v25_v0 = vld [vmem:[%s436_s1 + $0x8] sm:$0xff]  ;;  %v24_v1 = vld [vmem:[%s436_s1] sm:$0xff]  ;;  %v126_v3 = vld [vmem:[%s437_s2 + $0x38] sm:$0xff] }
   0x2   :  { %v22_v2 = vld [vmem:[%s435_s0] sm:$0xff]  ;;  %288 = vmatprep.subr.msk.mxu0 %vm26_vm0, %v25_v0  ;;  %v125_v4 = vld [vmem:[%s437_s2 + $0x30] sm:$0xff]  ;;  %295 = vmatprep.subr.msk.mxu1 %vm114_vm1, %v126_v3 }
   0x3   :  { %292 = vmatprep.mubr.msk.f32.mxu0 %vm26_vm0, %v22_v2  ;;  %289 = vmatpush3.xpose.msk.msra.mxu0 %vm26_vm0, %v25_v0 }
   0x4   :  { %290 = vmatprep.subr.msk.mxu0 %vm26_vm0, %v24_v1  ;;  %296 = vmatpush3.xpose.msk.msra.mxu1 %vm114_vm1, %v126_v3 }
   0x5   :  { %9 = vsyncpa [#allocation4], 0  ;;  %297 = vmatprep.subr.msk.mxu1 %vm114_vm1, %v125_v4  ;;  %v124_v5 = vld [vmem:[%s437_s2 + $0x28] sm:$0xff]  ;;  %v123_v7 = vld [vmem:[%s437_s2 + $0x20] sm:$0xff]  ;;  %s339_s12 = smov [#allocation3]   ;;  %vm240_vm2 = vcmask 523264  }
   0x6   :  { %v23_v6 = vld [vmem:[%s435_s0 + $0x8] sm:$0xff]  ;;  %v122_v8 = vld [vmem:[%s437_s2 + $0x18] sm:$0xff]  ;;  %v121_v9 = vld [vmem:[%s437_s2 + $0x10] sm:$0xff]  ;;  %s248_s13 = sshll.u32 %s339_s12, 4  ;;  %s249_s13 = int_to_ptr.vmem [resolvable:$true] %s248_s13 }
   0x7   :  { %291 = vmatpush3.xpose.msk.msra.mxu0 %vm26_vm0, %v24_v1  ;;  %v120_v10 = vld [vmem:[%s437_s2 + $0x8] sm:$0xff]  ;;  %v119_v11 = vld [vmem:[%s437_s2] sm:$0xff]  ;;  %s317_s14 = scalar_lea.vmem %s249_s13, 256  ;;  %p322_p1 = scmp.lt.s32.totalorder %s249_s13, %s249_s13 }
   0x8   :  { %298 = vmatpush3.xpose.msk.msra.mxu1 %vm114_vm1, %v125_v4  ;;  %v263_v16 = vld [vmem:[%s438_s3] ss:$0 sm:$0xff]  ;;  %p318_p0 = scmp.ne.s32.totalorder %s249_s13, %s317_s14  ;;  %p323_p2 = scmp.lt.s32.totalorder %s317_s14, %s317_s14 }
   0x9   :  { %299 = vmatprep.subr.msk.mxu1 %vm114_vm1, %v124_v5 }
   0xa   :  { %293 = vmatmul.mubr.msk.f32.vlgmr.msra.gmra.mxu0 %vm26_vm0, %v23_v6  ;;  %p324_p3 = por %p323_p2, %p322_p1 }
   0xc   :  { %300 = vmatpush3.xpose.msk.msra.mxu1 %vm114_vm1, %v124_v5  ;;  %p325_p4 = pnand %p324_p3, %p318_p0 }
   0xd   :  { %301 = vmatprep.subr.msk.mxu1 %vm114_vm1, %v123_v7 }
  0x10   :  { %302 = vmatpush3.xpose.msk.msra.mxu1 %vm114_vm1, %v123_v7 }
  0x11   :  { %303 = vmatprep.subr.msk.mxu1 %vm114_vm1, %v122_v8 }
  0x14   :  { %304 = vmatpush3.xpose.msk.msra.mxu1 %vm114_vm1, %v122_v8 }
  0x15   :  { %305 = vmatprep.subr.msk.mxu1 %vm114_vm1, %v121_v9 }
  0x18   :  { %306 = vmatpush3.xpose.msk.msra.mxu1 %vm114_vm1, %v121_v9 }
  0x19   :  { %307 = vmatprep.subr.msk.mxu1 %vm114_vm1, %v120_v10 }
  0x1c   :  { %308 = vmatpush3.xpose.msk.msra.mxu1 %vm114_vm1, %v120_v10 }
  0x1d   :  { %309 = vmatprep.subr.msk.mxu1 %vm114_vm1, %v119_v11 }
  0x20   :  { %310 = vmatpush3.xpose.msk.msra.mxu1 %vm114_vm1, %v119_v11 }
  0xca   :  { %v294_v12 = vpop.f32.mrf.mxu0 }
  0xcb   :  { %116 = vst.msk [vmem:[#allocation2 + $0x8] sm:$0xff] %vm114_vm1, %v294_v12 }
  0xcc   :  { %v105_v13 = vpop.f32.mrf.mxu0 }
  0xcd   :  { %115 = vst.msk [vmem:[#allocation2] sm:$0xff] %vm114_vm1, %v105_v13 }
  0xd2   :  { %v118_v15 = vld [vmem:[#allocation2 + $0x8] sm:$0xff] }
  0xd4   :  { %v117_v14 = vld [vmem:[#allocation2] sm:$0xff] }
  0xd5   :  { %311 = vmatprep.mubr.msk.f32.mxu1 %vm114_vm1, %v117_v14 }
  0xd6   :  { %312 = vmatmul.mubr.msk.f32.vlgmr.msra.gmra.mxu1 %vm114_vm1, %v118_v15 }
 0x196   :  { %v313_v17 = vpop.f32.mrf.mxu1 }
 0x197   :  { %v237_v18 = vadd.f32 %v313_v17, %v263_v16 }
 0x198   :  { %v231_v19 = vpop.f32.mrf.mxu1 }
 0x199   :  { %242 = vst.msk [vmem:[#allocation3 + $0x8] sm:$0xff] %vm240_vm2, %v237_v18  ;;  %v232_v20 = vadd.f32 %v263_v16, %v231_v19 }
 0x19b   :  { %241 = vst.msk [vmem:[#allocation3] sm:$0xff] %vm240_vm2, %v232_v20 }
 0x19c   :  { %328 = shalt.err (!%p325_p4)
}
 0x19d   :  { %s340_s15 = smov 128   ;;  %s341_s16 = smov 8  }
 0x19e   :  { %254 = dma.vmem_to_hbm [thread:$0]  %s249_s13, 256, %s439_s4, [#allocation4], %s340_s15, %s340_s15, %s341_s16  }
 0x19f   :  { %337 = dma.done.wait [#allocation4], 256  }
 0x1a0   :  { %338 = vsyncadd [#allocation4], 4294967040 }
 0x1a1   :  { %258 = vsyncpa [#allocation4], 1 }

</bundles_post_ra>
